<compile_context>
chip_gen: v6e
topology: v6e:2x2x1
jax: 0.10.0
libtpu: 0.0.40
codegen_flags: <defaults>
</compile_context>

<pallas_src>
import functools

import jax
import jax.numpy as jnp
from jax.experimental import pallas as pl
from jax.experimental.pallas import tpu as pltpu


_TM_CAP = 512          # rows per output tile
_TN_CAP_BLOCKS = 4     # tn cap = 4 * 128 = 512 lanes
_TK_CAP_F32 = 512
_TK_CAP_BF16 = 1024


def _round_up(x, m):
    return ((x + m - 1) // m) * m


# ---------------------------------------------------------------------------
# Kernels
# ---------------------------------------------------------------------------
def _linear_kernel_f32out(x_ref, wt_ref, b_ref, o_ref):
    """One (tm, tn) f32 output tile, accumulated directly in the resident
    output block over the K grid axis (out index_map ignores k)."""
    k = pl.program_id(2)

    @pl.when(k == 0)
    def _():
        # Initialise with the broadcast bias -> no separate epilogue add.
        o_ref[...] = jnp.broadcast_to(b_ref[...], o_ref.shape)

    # x stays f32 in HBM; cast to the (possibly bf16) weight dtype in-register.
    o_ref[...] += jnp.dot(
        x_ref[...].astype(wt_ref.dtype), wt_ref[...],
        preferred_element_type=jnp.float32,
    )


def _linear_kernel_acc(x_ref, wt_ref, b_ref, o_ref, acc_ref):
    """Same computation, but with an f32 VMEM accumulator for non-f32 outputs."""
    k = pl.program_id(2)

    @pl.when(k == 0)
    def _():
        acc_ref[...] = jnp.broadcast_to(b_ref[...], acc_ref.shape)

    acc_ref[...] += jnp.dot(
        x_ref[...].astype(wt_ref.dtype), wt_ref[...],
        preferred_element_type=jnp.float32,
    )

    @pl.when(k == pl.num_programs(2) - 1)
    def _():
        o_ref[...] = acc_ref[...].astype(o_ref.dtype)


# ---------------------------------------------------------------------------
# Tile selection (all static Python on static shapes)
# ---------------------------------------------------------------------------
def _pick_tk(K, weight_dtype):
    cap = _TK_CAP_BF16 if weight_dtype == jnp.bfloat16 else _TK_CAP_F32
    return min(cap, _round_up(K, 128))


def _pick_tm(M, Kp, Np):
    """Largest tm (<= 512, multiple of 8) minimising approximate HBM traffic:
    x + out read/written once per (padded) row, W re-streamed once per M block."""
    m8 = _round_up(M, 8)
    if m8 <= _TM_CAP:
        return m8  # single M block, minimal padding
    best_tm, best_cost = 8, None
    for tm in (512, 384, 256, 128, 64, 32, 16, 8):
        Mp = _round_up(M, tm)
        cost = Mp * (Kp + Np) + (Mp // tm) * Kp * Np
        if best_cost is None or cost < best_cost:
            best_tm, best_cost = tm, cost
    return best_tm


def _pick_tn(Np, single_m_block):
    """Largest multiple-of-128 divisor of Np up to 512.  If the M axis has a
    single block, ensure >= 2 N blocks so v7x's 2 TensorCores both get work."""
    q = Np // 128
    max_blocks = min(q, _TN_CAP_BLOCKS)
    if single_m_block and q >= 2:
        max_blocks = min(max_blocks, q // 2)
    for d in range(max_blocks, 0, -1):
        if q % d == 0:
            return d * 128
    return 128


# ---------------------------------------------------------------------------
# Parameter prep (one-time) + forward
# ---------------------------------------------------------------------------
def prepare_params(weight, bias, use_bf16=False):
    """One-time parameter prep, hoisted out of the per-call path.

    weight: (out_size, in_size) PyTorch layout -> wt_p: (Kp, Np), K/N zero-padded
            to tile/lane multiples, optionally cast to bf16 (f32 accumulation).
    bias:   (out_size,) -> b_p: (1, Np), kept f32 (epilogue math stays f32).
    """
    weight = jnp.asarray(weight, dtype=jnp.float32)
    bias = jnp.asarray(bias, dtype=jnp.float32)
    out_size, in_size = weight.shape

    w_dtype = jnp.bfloat16 if use_bf16 else jnp.float32
    tk = _pick_tk(in_size, w_dtype)
    Kp = _round_up(in_size, tk)
    Np = _round_up(out_size, 128)

    wt = weight.T  # (K, N)
    wt_p = jnp.pad(wt, ((0, Kp - in_size), (0, Np - out_size))).astype(w_dtype)
    b_p = jnp.pad(bias.reshape(1, -1), ((0, 0), (0, Np - out_size)))
    return wt_p, b_p, out_size


@functools.partial(jax.jit, static_argnames=("out_size",))
def target_forward(x, wt_p, b_p, out_size):
    """Forward pass of Target: x @ W^T + b, using pre-padded wt_p/b_p.

    x:    (batch, in_size) float32 (or bf16)
    wt_p: (Kp, Np) pre-transposed, pre-padded, possibly bf16 weight
    b_p:  (1, Np) float32 bias
    returns (batch, out_size) in x.dtype
    """
    M, K = x.shape
    Kp, Np = wt_p.shape
    assert Kp >= K and Kp % 128 == 0
    assert Np % 128 == 0 and b_p.shape == (1, Np)

    cap_k = _TK_CAP_BF16 if wt_p.dtype == jnp.bfloat16 else _TK_CAP_F32
    tk = min(cap_k, Kp)           # divides Kp by construction of prepare_params
    tm = _pick_tm(M, Kp, Np)
    Mp = _round_up(M, tm)
    tn = _pick_tn(Np, single_m_block=(Mp // tm == 1))

    # Per-call activation padding only: K zero-pad contributes nothing to the
    # dot; padded M rows are sliced off below.  Weight/bias padding and the
    # bf16 cast were done once in prepare_params.
    xp = x if (Mp == M and Kp == K) else jnp.pad(x, ((0, Mp - M), (0, Kp - K)))

    out_dtype = x.dtype
    use_acc = out_dtype != jnp.float32
    kernel = _linear_kernel_acc if use_acc else _linear_kernel_f32out
    scratch = [pltpu.VMEM((tm, tn), jnp.float32)] if use_acc else []

    bytes_accessed = (
        Mp * Kp * xp.dtype.itemsize
        + Kp * Np * wt_p.dtype.itemsize
        + Np * b_p.dtype.itemsize
        + Mp * Np * jnp.dtype(out_dtype).itemsize
    )

    out = pl.pallas_call(
        kernel,
        out_shape=jax.ShapeDtypeStruct((Mp, Np), out_dtype),
        grid=(Mp // tm, Np // tn, Kp // tk),
        in_specs=[
            pl.BlockSpec((tm, tk), lambda i, j, k: (i, k)),
            pl.BlockSpec((tk, tn), lambda i, j, k: (k, j)),
            # Bias index ignores k -> resident across the whole K reduction.
            pl.BlockSpec((1, tn), lambda i, j, k: (0, j)),
        ],
        # Output index ignores k -> K-resident block (accumulator pattern).
        out_specs=pl.BlockSpec((tm, tn), lambda i, j, k: (i, j)),
        scratch_shapes=scratch,
        compiler_params=pltpu.CompilerParams(
            dimension_semantics=("parallel", "parallel", "arbitrary"),
            vmem_limit_bytes=32 * 1024 * 1024,
        ),
        cost_estimate=pl.CostEstimate(
            flops=2 * Mp * Np * Kp,
            transcendentals=0,
            bytes_accessed=bytes_accessed,
        ),
    )(xp, wt_p, b_p)

    if Mp != M or Np != out_size:
        out = out[:M, :out_size]
    return out


if __name__ == "__main__":
    # Small shapes consistent with the module: in_size=32, out_size=16, batch=8.
    # TODO(synk): at this toy size plain XLA (x @ wt + b) beats any kernel; the
    # tiled kernel is written for production-sized Linears.
    in_size, out_size, batch = 32, 16, 8

    key = jax.random.PRNGKey(0)
    kx, kw, kb = jax.random.split(key, 3)

    x = jax.random.normal(kx, (batch, in_size), dtype=jnp.float32)
    # Deterministic init mimicking nn.Linear's uniform(-1/sqrt(in), 1/sqrt(in)).
    bound = 1.0 / jnp.sqrt(jnp.float32(in_size))
    weight = jax.random.uniform(kw, (out_size, in_size), minval=-bound,
                                maxval=bound, dtype=jnp.float32)
    bias = jax.random.uniform(kb, (out_size,), minval=-bound,
                              maxval=bound, dtype=jnp.float32)

    # One-time parameter prep (transpose + pad + optional bf16 cast hoisted
    # out of the call path).  f32 path here so the strict allclose holds.
    wt_p, b_p, n_out = prepare_params(weight, bias, use_bf16=False)

    y = target_forward(x, wt_p, b_p, n_out)
    jax.block_until_ready(y)

    # Reference check against plain JAX.
    y_ref = x @ weight.T + bias
    assert y.shape == (batch, out_size)
    assert jnp.allclose(y, y_ref, atol=1e-5, rtol=1e-5)

    print("KERNEL_OK")
</pallas_src>

<mosaic_0001>
module attributes {stable_mosaic.version = 11 : i64} {
  func.func @_linear_kernel_f32out(%arg0: i32, %arg1: i32, %arg2: i32, %arg3: memref<8x128xf32, #tpu.memory_space<vmem>>, %arg4: memref<128x128xf32, #tpu.memory_space<vmem>>, %arg5: memref<1x128xf32, #tpu.memory_space<vmem>>, %arg6: memref<8x128xf32, #tpu.memory_space<vmem>>) attributes {dimension_semantics = [#tpu.dimension_semantics<parallel>, #tpu.dimension_semantics<parallel>, #tpu.dimension_semantics<arbitrary>], iteration_bounds = array<i64: 1, 1, 1>, scalar_prefetch = 0 : i64, scratch_operands = 0 : i64, tpu.core_type = #tpu.core_type<tc>, window_params = [{transform_indices = @transform_0, window_bounds = array<i64: 8, 128>}, {transform_indices = @transform_1, window_bounds = array<i64: 128, 128>}, {transform_indices = @transform_2, window_bounds = array<i64: 1, 128>}, {transform_indices = @transform_3, window_bounds = array<i64: 8, 128>}]} {
    %c0_i32 = arith.constant 0 : i32
    %0 = arith.cmpi eq, %arg2, %c0_i32 : i32
    %1 = arith.extui %0 : i1 to i32
    %c0_i32_0 = arith.constant 0 : i32
    %2 = arith.cmpi ne, %1, %c0_i32_0 : i32
    scf.if %2 {
      %c0_8 = arith.constant 0 : index
      %c0_9 = arith.constant 0 : index
      %9 = vector.load %arg5[%c0_8, %c0_9] : memref<1x128xf32, #tpu.memory_space<vmem>>, vector<1x128xf32>
      %10 = vector.shape_cast %9 : vector<1x128xf32> to vector<1x128xf32>
      %11 = vector.broadcast %10 : vector<1x128xf32> to vector<8x128xf32>
      %c0_10 = arith.constant 0 : index
      %c0_11 = arith.constant 0 : index
      %12 = vector.load %arg6[%c0_10, %c0_11] : memref<8x128xf32, #tpu.memory_space<vmem>>, vector<8x128xf32>
      tpu.vector_store %arg6[%c0_10, %c0_11], %11 {strides = array<i32>} : memref<8x128xf32, #tpu.memory_space<vmem>>, vector<8x128xf32>,
    } else {
    }
    %c0 = arith.constant 0 : index
    %c0_1 = arith.constant 0 : index
    %3 = vector.load %arg6[%c0, %c0_1] : memref<8x128xf32, #tpu.memory_space<vmem>>, vector<8x128xf32>
    %c0_2 = arith.constant 0 : index
    %c0_3 = arith.constant 0 : index
    %4 = vector.load %arg3[%c0_2, %c0_3] : memref<8x128xf32, #tpu.memory_space<vmem>>, vector<8x128xf32>
    %c0_4 = arith.constant 0 : index
    %c0_5 = arith.constant 0 : index
    %5 = vector.load %arg4[%c0_4, %c0_5] : memref<128x128xf32, #tpu.memory_space<vmem>>, vector<128x128xf32>
    %cst = arith.constant dense<0.000000e+00> : vector<8x128xf32>
    %6 = tpu.matmul %4, %5, %cst {dimension_numbers = #tpu.dot_dimension_numbers<[1], [0], [0], [1], [0, 0, 1, 1], [], []>} : vector<8x128xf32>, vector<128x128xf32>, vector<8x128xf32> -> vector<8x128xf32>
    %7 = arith.addf %3, %6 : vector<8x128xf32>
    %c0_6 = arith.constant 0 : index
    %c0_7 = arith.constant 0 : index
    %8 = vector.load %arg6[%c0_6, %c0_7] : memref<8x128xf32, #tpu.memory_space<vmem>>, vector<8x128xf32>
    tpu.vector_store %arg6[%c0_6, %c0_7], %7 {strides = array<i32>} : memref<8x128xf32, #tpu.memory_space<vmem>>, vector<8x128xf32>,
    return
  }
  func.func @transform_0(%arg0: i32, %arg1: i32, %arg2: i32) -> (i32, i32) {
    %c0_i32 = arith.constant 0 : i32
    return %arg0, %arg2 : i32, i32
  }
  func.func @transform_1(%arg0: i32, %arg1: i32, %arg2: i32) -> (i32, i32) {
    %c0_i32 = arith.constant 0 : i32
    return %arg2, %arg1 : i32, i32
  }
  func.func @transform_2(%arg0: i32, %arg1: i32, %arg2: i32) -> (i32, i32) {
    %c0_i32 = arith.constant 0 : i32
    %c0_i32_0 = arith.constant 0 : i32
    return %c0_i32, %arg1 : i32, i32
  }
  func.func @transform_3(%arg0: i32, %arg1: i32, %arg2: i32) -> (i32, i32) {
    %c0_i32 = arith.constant 0 : i32
    return %arg0, %arg1 : i32, i32
  }
}

</mosaic_0001>

<bundles_post_ra>
// kernel: target_forward.1
= control target key start
LH: loop header
LB: loop body
LE: loop exit
PB: predicated region body
PF: predicated region fallthrough
CT: control target
= control target key end

     0   :  { %8 = vsyncpa [#allocation3], 0  ;;  %s287_s0 = inlined_call_operand.vmem [shape: f32[8,128], index: 0, kind: input, shape index: {}]   ;;  %s288_s1 = inlined_call_operand.hbm [shape: f32[128,128], index: 1, kind: input, shape index: {}]   ;;  %s289_s2 = inlined_call_operand.vmem [shape: f32[1,128], index: 2, kind: input, shape index: {}]   ;;  %s290_s3 = inlined_call_operand.hbm [shape: f32[8,128], index: 3, kind: output, shape index: {}]  }
   0x1   :  { %9 = vsyncpa [#allocation4], 0  ;;  %s249_s12 = smov [#allocation2]  }
   0x2   :  { %s17_s13 = sshll.u32 %s249_s12, 4  ;;  %s18_s13 = int_to_ptr.vmem [resolvable:$true] %s17_s13 }
   0x3   :  { %s213_s14 = scalar_lea.vmem %s18_s13, 2048  ;;  %p218_p1 = scmp.lt.s32.totalorder %s18_s13, %s18_s13 }
   0x4   :  { %p214_p0 = scmp.ne.s32.totalorder %s18_s13, %s213_s14  ;;  %p219_p2 = scmp.lt.s32.totalorder %s213_s14, %s213_s14 }
   0x6   :  { %p220_p3 = por %p219_p2, %p218_p1 }
   0x8   :  { %p221_p4 = pnand %p220_p3, %p214_p0 }
   0xa   :  { %224 = shalt.err (!%p221_p4)
}
   0xb   :  { %s250_s15 = smov 128   ;;  %s251_s16 = smov 8  }
   0xc   :  { %23 = dma.hbm_to_vmem [thread:$0]  %s288_s1, 2048, %s18_s13, [#allocation3], %s250_s15, %s250_s15, %s251_s16  }
   0xd   :  { %245 = dma.done.wait [#allocation3], 2048  }
   0xe   :  { %246 = vsyncadd [#allocation3], 4294965248  ;;  %v252_v0 = vmov 0.0   ;;  %vm253_vm0 = vmmov 0   ;;  %v58_v1 = vld [vmem:[#allocation2 + $0x78] sm:$0xff]  ;;  %v57_v2 = vld [vmem:[#allocation2 + $0x70] sm:$0xff] }
   0xf   :  { %164 = vmatprep.subr.mxu0 %v252_v0  ;;  %196 = vmatprep.mubr.msk.f32.mxu0 %vm253_vm0, %v252_v0  ;;  %v56_v3 = vld [vmem:[#allocation2 + $0x68] sm:$0xff]  ;;  %v55_v4 = vld [vmem:[#allocation2 + $0x60] sm:$0xff]  ;;  %v54_v5 = vld [vmem:[#allocation2 + $0x58] sm:$0xff]  ;;  %s254_s22 = smov [#allocation5]  }
  0x10   :  { %165 = vmatpush3.msra.mxu0 %v58_v1  ;;  %v53_v6 = vld [vmem:[#allocation2 + $0x50] sm:$0xff]  ;;  %v52_v7 = vld [vmem:[#allocation2 + $0x48] sm:$0xff]  ;;  %v51_v8 = vld [vmem:[#allocation2 + $0x40] sm:$0xff]  ;;  %s137_s23 = sshll.u32 %s254_s22, 4  ;;  %s138_s23 = int_to_ptr.vmem [resolvable:$true] %s137_s23 }
  0x11   :  { %166 = vmatprep.subr.mxu0 %v252_v0  ;;  %v50_v9 = vld [vmem:[#allocation2 + $0x38] sm:$0xff]  ;;  %v49_v10 = vld [vmem:[#allocation2 + $0x30] sm:$0xff]  ;;  %v48_v11 = vld [vmem:[#allocation2 + $0x28] sm:$0xff]  ;;  %s225_s24 = scalar_lea.vmem %s138_s23, 128  ;;  %p230_p6 = scmp.lt.s32.totalorder %s138_s23, %s138_s23 }
  0x12   :  { %167 = vmatpush3.msra.mxu0 %v57_v2  ;;  %v47_v12 = vld [vmem:[#allocation2 + $0x20] sm:$0xff]  ;;  %v46_v13 = vld [vmem:[#allocation2 + $0x18] sm:$0xff]  ;;  %v45_v14 = vld [vmem:[#allocation2 + $0x10] sm:$0xff]  ;;  %p226_p5 = scmp.ne.s32.totalorder %s138_s23, %s225_s24  ;;  %p231_p7 = scmp.lt.s32.totalorder %s225_s24, %s225_s24 }
  0x13   :  { %168 = vmatprep.subr.mxu0 %v252_v0  ;;  %v44_v15 = vld [vmem:[#allocation2 + $0x8] sm:$0xff]  ;;  %v43_v16 = vld [vmem:[#allocation2] sm:$0xff] }
  0x14   :  { %169 = vmatpush3.msra.mxu0 %v56_v3  ;;  %v42_v17 = vld [vmem:[%s287_s0] sm:$0xff]  ;;  %p232_p8 = por %p231_p7, %p230_p6 }
  0x15   :  { %170 = vmatprep.subr.mxu0 %v252_v0  ;;  %v146_v18 = vld [vmem:[%s289_s2] ss:$0 sm:$0xff] }
  0x16   :  { %171 = vmatpush3.msra.mxu0 %v55_v4  ;;  %p233_p9 = pnand %p232_p8, %p226_p5 }
  0x17   :  { %172 = vmatprep.subr.mxu0 %v252_v0 }
  0x18   :  { %173 = vmatpush3.msra.mxu0 %v54_v5 }
  0x19   :  { %174 = vmatprep.subr.mxu0 %v252_v0 }
  0x1a   :  { %175 = vmatpush3.msra.mxu0 %v53_v6 }
  0x1b   :  { %176 = vmatprep.subr.mxu0 %v252_v0 }
  0x1c   :  { %177 = vmatpush3.msra.mxu0 %v52_v7 }
  0x1d   :  { %178 = vmatprep.subr.mxu0 %v252_v0 }
  0x1e   :  { %179 = vmatpush3.msra.mxu0 %v51_v8 }
  0x1f   :  { %180 = vmatprep.subr.mxu0 %v252_v0 }
  0x20   :  { %181 = vmatpush3.msra.mxu0 %v50_v9 }
  0x21   :  { %182 = vmatprep.subr.mxu0 %v252_v0 }
  0x22   :  { %183 = vmatpush3.msra.mxu0 %v49_v10 }
  0x23   :  { %184 = vmatprep.subr.mxu0 %v252_v0 }
  0x24   :  { %185 = vmatpush3.msra.mxu0 %v48_v11 }
  0x25   :  { %186 = vmatprep.subr.mxu0 %v252_v0 }
  0x26   :  { %187 = vmatpush3.msra.mxu0 %v47_v12 }
  0x27   :  { %188 = vmatprep.subr.mxu0 %v252_v0 }
  0x28   :  { %189 = vmatpush3.msra.mxu0 %v46_v13 }
  0x29   :  { %190 = vmatprep.subr.mxu0 %v252_v0 }
  0x2a   :  { %191 = vmatpush3.msra.mxu0 %v45_v14 }
  0x2b   :  { %192 = vmatprep.subr.mxu0 %v252_v0 }
  0x2c   :  { %193 = vmatpush3.msra.mxu0 %v44_v15 }
  0x2d   :  { %194 = vmatprep.subr.mxu0 %v252_v0 }
  0x2e   :  { %195 = vmatpush3.msra.mxu0 %v43_v16 }
  0x2f   :  { %197 = vmatmul.mubr.f32.vlgmr.msra.gmra.mxu0 %v42_v17 }
  0xef   :  { %v125_v19 = vpop.f32.mrf.mxu0 }
  0xf0   :  { %v129_v20 = vadd.f32 %v146_v18, %v125_v19 }
  0xf1   :  { %v198_v21 = vpop.f32.mrf.mxu0 }
  0xf2   :  { %130 = vst [vmem:[#allocation5] sm:$0xff] %v129_v20 }
  0xf3   :  { %236 = shalt.err (!%p233_p9)
}
  0xf4   :  { %140 = dma.vmem_to_hbm [thread:$0]  %s138_s23, 128, %s290_s3, [#allocation4]  }
  0xf5   :  { %247 = dma.done.wait [#allocation4], 128  }
  0xf6   :  { %248 = vsyncadd [#allocation4], 4294967168 }
  0xf7   :  { %144 = vsyncpa [#allocation3], 1 }
  0xf8   :  { %145 = vsyncpa [#allocation4], 1 }

</bundles_post_ra>
